<compile_context>
chip_gen: v5e
topology: v5e:2x2
jax: 0.10.0
libtpu: 0.0.40
codegen_flags: <defaults>
</compile_context>

<pallas_src>
import functools

import jax
import jax.numpy as jnp
from jax.experimental import pallas as pl
from jax.experimental.pallas import tpu as pltpu


def _round_up(a, m):
    return (a + m - 1) // m * m


def _vmem_plan():
    """(block_bytes, vmem_limit_bytes, vmem_capacity) sized per TPU generation."""
    try:
        cap = int(pltpu.get_tpu_info().vmem_capacity_bytes)
    except Exception:
        cap = 64 << 20                       # conservative fallback (v7x physical VMEM)
    if cap >= (96 << 20):                    # v5e / v6e: 128 MiB physical VMEM
        return 14 << 20, 100 << 20, cap
    return 8 << 20, 56 << 20, cap            # v7x: 64 MiB physical VMEM


def _plan_rows(rows, row_vmem_bytes, block_bytes):
    """Return (padded_rows, block_rows) with layout-legal, VMEM-bounded blocks."""
    if rows % 8 != 0:
        # A full-span block (block rows == array rows) is always layout-legal; use it if it fits,
        # otherwise zero-pad the row axis to a multiple of 8 (zero rows contribute zero residual).
        if rows < 8 or rows * row_vmem_bytes <= block_bytes:
            return rows, rows
        rows = _round_up(rows, 8)
    max_tbr = max(8, (block_bytes // row_vmem_bytes) // 8 * 8)
    cands = [t for t in range(8, rows + 1, 8) if rows % t == 0 and t <= max_tbr]
    tbr = max(cands) if cands else min(rows, 8)
    return rows, tbr


def _pde_loss_kernel(mask_ref, x_ref, z_ref, out_ref, acc_ref, *, w,
                     skip_first_step_on_tail_core):
    c = pl.program_id(0)          # "parallel" axis (dual-TC on v7x, sequential elsewhere)
    i = pl.program_id(1)          # "arbitrary" reduction axis
    n_i = pl.num_programs(1)
    _, hw = acc_ref.shape         # hw = H*W (one image per lane-dense row)

    @pl.when(i == 0)
    def _init():
        acc_ref[...] = jnp.zeros_like(acc_ref)

    def _accumulate():
        z = z_ref[...]
        x = x_ref[...]
        if z.dtype != jnp.float32:
            z = z.astype(jnp.float32)
        if x.dtype != jnp.float32:
            x = x.astype(jnp.float32)

        # Neighbour-existence masks (broadcast (1, hw) -> (rows, hw)); lane rolls wrap across
        # image-row boundaries / image ends, but those contributions are masked to zero, which
        # matches the zero-padded 5-point Laplacian stencil.
        m_up = mask_ref[0:1, :]
        m_dn = mask_ref[1:2, :]
        m_lf = mask_ref[2:3, :]
        m_rt = mask_ref[3:4, :]

        r = -4.0 * z - x
        r_row = (pltpu.roll(z, shift=w, axis=1) * m_up
                 + pltpu.roll(z, shift=hw - w, axis=1) * m_dn)
        r_col = (pltpu.roll(z, shift=1, axis=1) * m_lf
                 + pltpu.roll(z, shift=hw - 1, axis=1) * m_rt)
        r = r + r_row + r_col
        acc_ref[...] += r * r     # elementwise f32 accumulation; single reduce at the end

    if skip_first_step_on_tail_core:
        # Odd block count split over 2 cores: the tail core's first block duplicates a block the
        # first core already owns — fetch it (in-bounds DMA) but skip its accumulation.
        @pl.when(jnp.logical_or(c == 0, i > 0))
        def _acc_guarded():
            _accumulate()
    else:
        _accumulate()

    @pl.when(i == n_i - 1)
    def _finalize():
        out_ref[...] = jnp.full((1, 1, 1), jnp.sum(acc_ref[...]), dtype=jnp.float32)


def pde_loss_zx(x, z_hat, reduction="mean", lmbda=1.0, *, block_bytes=None):
    """x, z_hat: NCHW arrays of identical shape. Returns scalar loss."""
    assert x.shape == z_hat.shape
    B, C, H, W = x.shape
    rows = B * C
    hw = H * W

    default_block, vmem_base, vmem_cap = _vmem_plan()
    if block_bytes is None:
        block_bytes = default_block

    lanes = _round_up(max(hw, 1), 128)        # VMEM lane footprint of one image row
    row_vmem = lanes * 4

    # Free reshape (no transpose, no HBM copy): one image per row, lane-dense last dim.
    xf = x.reshape(rows, hw)
    zf = z_hat.reshape(rows, hw)

    rows_p, tbr = _plan_rows(rows, row_vmem, block_bytes)
    if rows_p != rows:
        pad = ((0, rows_p - rows), (0, 0))    # zero rows -> zero residual -> zero contribution
        xf = jnp.pad(xf, pad)
        zf = jnp.pad(zf, pad)

    n_blocks = rows_p // tbr
    ncores = 2 if n_blocks >= 2 else 1        # dual-TC split whenever possible (v7x)
    per_core = -(-n_blocks // ncores)         # ceil
    shift = n_blocks - per_core               # per-core block-start stride (== per_core if even)
    overlap = (ncores * per_core != n_blocks)

    # Flat-pixel neighbour-existence masks (4, hw): up / down / left / right.
    p = jnp.arange(hw, dtype=jnp.int32)
    col = p % W
    masks = jnp.stack(
        [(p >= W), (p < hw - W), (col > 0), (col < W - 1)], axis=0
    ).astype(jnp.float32)

    block_vmem = _round_up(tbr, 8) * row_vmem
    needed = 5 * block_vmem + 8 * row_vmem + (2 << 20)   # 2 inputs x 2 bufs + acc + masks + slack
    vmem_limit = int(min(max(vmem_base, needed), vmem_cap - (2 << 20)))

    kernel = functools.partial(_pde_loss_kernel, w=W,
                               skip_first_step_on_tail_core=overlap)

    def in_idx(c, i):
        return (c * shift + i, 0)

    out = pl.pallas_call(
        kernel,
        out_shape=jax.ShapeDtypeStruct((ncores, 1, 1), jnp.float32),
        grid_spec=pltpu.PrefetchScalarGridSpec(
            num_scalar_prefetch=0,
            grid=(ncores, per_core),
            in_specs=[
                pl.BlockSpec((4, hw), lambda c, i: (0, 0)),   # resident masks (tiny)
                pl.BlockSpec((tbr, hw), in_idx),
                pl.BlockSpec((tbr, hw), in_idx),
            ],
            out_specs=pl.BlockSpec((1, 1, 1), lambda c, i: (c, 0, 0)),
            scratch_shapes=[pltpu.VMEM((tbr, hw), jnp.float32)],   # elementwise accumulator
        ),
        compiler_params=pltpu.CompilerParams(
            dimension_semantics=("parallel", "arbitrary"),
            vmem_limit_bytes=vmem_limit,
        ),
        cost_estimate=pl.CostEstimate(
            flops=14 * rows_p * hw,
            transcendentals=0,
            bytes_accessed=(xf.size * xf.dtype.itemsize + zf.size * zf.dtype.itemsize
                            + masks.size * 4 + ncores * 4),
        ),
    )(masks, xf, zf)

    total = jnp.sum(out)                       # combine per-core partial sums
    if reduction == "mean":
        total = total / jnp.float32(float(B * C * H * W))   # Python float: no int32 overflow
    elif reduction == "sum":
        pass
    else:
        # TODO(synk): reduction='none' semantics depend on the unspecified loss_calculator.
        raise NotImplementedError(f"unsupported reduction: {reduction}")
    return jnp.float32(lmbda) * total


def _reference_mean(x, z_hat):
    # Pure-JAX reference (mean reduction) for the Laplacian-residual stand-in.
    zp = jnp.pad(z_hat, ((0, 0), (0, 0), (1, 1), (1, 1)))
    lap = (zp[:, :, :-2, 1:-1] + zp[:, :, 2:, 1:-1]
           + zp[:, :, 1:-1, :-2] + zp[:, :, 1:-1, 2:] - 4.0 * z_hat)
    r = lap - x
    return jnp.mean(r * r)


if __name__ == "__main__":
    key = jax.random.PRNGKey(0)
    k1, k2 = jax.random.split(key)
    B, C, H, W = 2, 4, 16, 16
    x = jax.random.normal(k1, (B, C, H, W), dtype=jnp.float32)
    z_hat = jax.random.normal(k2, (B, C, H, W), dtype=jnp.float32)

    loss = jax.block_until_ready(pde_loss_zx(x, z_hat, reduction="mean", lmbda=1.0))
    ref = _reference_mean(x, z_hat)
    assert jnp.allclose(loss, ref, rtol=1e-5, atol=1e-5), (loss, ref)

    loss_sum = jax.block_until_ready(pde_loss_zx(x, z_hat, reduction="sum", lmbda=1.0))
    ref_sum = ref * (B * C * H * W)
    assert jnp.allclose(loss_sum, ref_sum, rtol=1e-4, atol=1e-3), (loss_sum, ref_sum)

    # Multi-block / dual-core / odd-block-count path (tiny blocks forced via block_bytes).
    B2, C2, H2, W2 = 2, 12, 16, 16            # 24 image planes -> 3 blocks of 8 rows
    x2 = jax.random.normal(jax.random.PRNGKey(1), (B2, C2, H2, W2), dtype=jnp.float32)
    z2 = jax.random.normal(jax.random.PRNGKey(2), (B2, C2, H2, W2), dtype=jnp.float32)
    loss2 = jax.block_until_ready(pde_loss_zx(x2, z2, reduction="mean", block_bytes=8192))
    ref2 = _reference_mean(x2, z2)
    assert jnp.allclose(loss2, ref2, rtol=1e-5, atol=1e-5), (loss2, ref2)

    print("KERNEL_OK")
</pallas_src>

<mosaic_0001>
module attributes {stable_mosaic.version = 11 : i64} {
  func.func @_pde_loss_kernel(%arg0: i32, %arg1: i32, %arg2: memref<4x256xf32, #tpu.memory_space<vmem>>, %arg3: memref<8x256xf32, #tpu.memory_space<vmem>>, %arg4: memref<8x256xf32, #tpu.memory_space<vmem>>, %arg5: memref<1x1x1xf32, #tpu.memory_space<vmem>>, %arg6: memref<8x256xf32, #tpu.memory_space<vmem>>) attributes {dimension_semantics = [#tpu.dimension_semantics<parallel>, #tpu.dimension_semantics<arbitrary>], iteration_bounds = array<i64: 1, 1>, scalar_prefetch = 0 : i64, scratch_operands = 1 : i64, tpu.core_type = #tpu.core_type<tc>, window_params = [{pipeline_mode = #tpu.pipeline_mode<synchronous>, transform_indices = @transform_0, window_bounds = array<i64: 4, 256>}, {transform_indices = @transform_1, window_bounds = array<i64: 8, 256>}, {transform_indices = @transform_2, window_bounds = array<i64: 8, 256>}, {transform_indices = @transform_3, window_bounds = array<i64: 1, 1, 1>}]} {
    %c0_i32 = arith.constant 0 : i32
    %0 = arith.cmpi eq, %arg1, %c0_i32 : i32
    %1 = arith.extui %0 : i1 to i32
    %c0_i32_0 = arith.constant 0 : i32
    %2 = arith.cmpi ne, %1, %c0_i32_0 : i32
    scf.if %2 {
      %cst_15 = arith.constant 0.000000e+00 : f32
      %35 = vector.broadcast %cst_15 : f32 to vector<8x256xf32>
      %c0_16 = arith.constant 0 : index
      %c0_17 = arith.constant 0 : index
      %36 = vector.load %arg6[%c0_16, %c0_17] : memref<8x256xf32, #tpu.memory_space<vmem>>, vector<8x256xf32>
      tpu.vector_store %arg6[%c0_16, %c0_17], %35 {strides = array<i32>} : memref<8x256xf32, #tpu.memory_space<vmem>>, vector<8x256xf32>,
    } else {
    }
    %c0 = arith.constant 0 : index
    %c0_1 = arith.constant 0 : index
    %3 = vector.load %arg4[%c0, %c0_1] : memref<8x256xf32, #tpu.memory_space<vmem>>, vector<8x256xf32>
    %c0_2 = arith.constant 0 : index
    %c0_3 = arith.constant 0 : index
    %4 = vector.load %arg3[%c0_2, %c0_3] : memref<8x256xf32, #tpu.memory_space<vmem>>, vector<8x256xf32>
    %c0_4 = arith.constant 0 : index
    %c0_5 = arith.constant 0 : index
    %5 = vector.load %arg2[%c0_4, %c0_5] : memref<4x256xf32, #tpu.memory_space<vmem>>, vector<1x256xf32>
    %c1 = arith.constant 1 : index
    %c0_6 = arith.constant 0 : index
    %6 = vector.load %arg2[%c1, %c0_6] : memref<4x256xf32, #tpu.memory_space<vmem>>, vector<1x256xf32>
    %c2 = arith.constant 2 : index
    %c0_7 = arith.constant 0 : index
    %7 = vector.load %arg2[%c2, %c0_7] : memref<4x256xf32, #tpu.memory_space<vmem>>, vector<1x256xf32>
    %c3 = arith.constant 3 : index
    %c0_8 = arith.constant 0 : index
    %8 = vector.load %arg2[%c3, %c0_8] : memref<4x256xf32, #tpu.memory_space<vmem>>, vector<1x256xf32>
    %cst = arith.constant -4.000000e+00 : f32
    %9 = vector.broadcast %cst : f32 to vector<8x256xf32>
    %10 = arith.mulf %9, %3 : vector<8x256xf32>
    %11 = arith.subf %10, %4 : vector<8x256xf32>
    %c16_i32 = arith.constant 16 : i32
    %12 = tpu.dynamic_rotate %3 by %c16_i32 dim 1 : vector<8x256xf32>, i32 -> vector<8x256xf32>
    %13 = vector.broadcast %5 : vector<1x256xf32> to vector<8x256xf32>
    %14 = arith.mulf %12, %13 : vector<8x256xf32>
    %c240_i32 = arith.constant 240 : i32
    %15 = tpu.dynamic_rotate %3 by %c240_i32 dim 1 : vector<8x256xf32>, i32 -> vector<8x256xf32>
    %16 = vector.broadcast %6 : vector<1x256xf32> to vector<8x256xf32>
    %17 = arith.mulf %15, %16 : vector<8x256xf32>
    %18 = arith.addf %14, %17 : vector<8x256xf32>
    %c1_i32 = arith.constant 1 : i32
    %19 = tpu.dynamic_rotate %3 by %c1_i32 dim 1 : vector<8x256xf32>, i32 -> vector<8x256xf32>
    %20 = vector.broadcast %7 : vector<1x256xf32> to vector<8x256xf32>
    %21 = arith.mulf %19, %20 : vector<8x256xf32>
    %c255_i32 = arith.constant 255 : i32
    %22 = tpu.dynamic_rotate %3 by %c255_i32 dim 1 : vector<8x256xf32>, i32 -> vector<8x256xf32>
    %23 = vector.broadcast %8 : vector<1x256xf32> to vector<8x256xf32>
    %24 = arith.mulf %22, %23 : vector<8x256xf32>
    %25 = arith.addf %21, %24 : vector<8x256xf32>
    %26 = arith.addf %11, %18 : vector<8x256xf32>
    %27 = arith.addf %26, %25 : vector<8x256xf32>
    %c0_9 = arith.constant 0 : index
    %c0_10 = arith.constant 0 : index
    %28 = vector.load %arg6[%c0_9, %c0_10] : memref<8x256xf32, #tpu.memory_space<vmem>>, vector<8x256xf32>
    %29 = arith.mulf %27, %27 : vector<8x256xf32>
    %30 = arith.addf %28, %29 : vector<8x256xf32>
    %c0_11 = arith.constant 0 : index
    %c0_12 = arith.constant 0 : index
    %31 = vector.load %arg6[%c0_11, %c0_12] : memref<8x256xf32, #tpu.memory_space<vmem>>, vector<8x256xf32>
    tpu.vector_store %arg6[%c0_11, %c0_12], %30 {strides = array<i32>} : memref<8x256xf32, #tpu.memory_space<vmem>>, vector<8x256xf32>,
    %c0_i32_13 = arith.constant 0 : i32
    %32 = arith.cmpi eq, %arg1, %c0_i32_13 : i32
    %33 = arith.extui %32 : i1 to i32
    %c0_i32_14 = arith.constant 0 : i32
    %34 = arith.cmpi ne, %33, %c0_i32_14 : i32
    scf.if %34 {
      %c0_15 = arith.constant 0 : index
      %c0_16 = arith.constant 0 : index
      %35 = vector.load %arg6[%c0_15, %c0_16] : memref<8x256xf32, #tpu.memory_space<vmem>>, vector<8x256xf32>
      %36 = vector.shape_cast %35 : vector<8x256xf32> to vector<1x8x256xf32>
      %cst_17 = arith.constant dense<0.000000e+00> : vector<1xf32>
      %37 = vector.multi_reduction <add>, %36, %cst_17 [1, 2] : vector<1x8x256xf32> to vector<1xf32>
      %38 = vector.shape_cast %37 : vector<1xf32> to vector<1x1x1xf32>
      %39 = vector.extract %38[0, 0, 0] : f32 from vector<1x1x1xf32>
      %40 = vector.broadcast %39 : f32 to vector<1x1x1xf32>
      %c0_18 = arith.constant 0 : index
      %c0_19 = arith.constant 0 : index
      %c0_20 = arith.constant 0 : index
      %41 = vector.load %arg5[%c0_18, %c0_19, %c0_20] : memref<1x1x1xf32, #tpu.memory_space<vmem>>, vector<1x1x1xf32>
      tpu.vector_store %arg5[%c0_18, %c0_19, %c0_20], %40 {strides = array<i32>} : memref<1x1x1xf32, #tpu.memory_space<vmem>>, vector<1x1x1xf32>,
    } else {
    }
    return
  }
  func.func @transform_0(%arg0: i32, %arg1: i32) -> (i32, i32) {
    %c0_i32 = arith.constant 0 : i32
    %c0_i32_0 = arith.constant 0 : i32
    %c0_i32_1 = arith.constant 0 : i32
    return %c0_i32, %c0_i32_0 : i32, i32
  }
  func.func @transform_1(%arg0: i32, %arg1: i32) -> (i32, i32) {
    %c0_i32 = arith.constant 0 : i32
    %0 = arith.muli %arg0, %c0_i32 : i32
    %1 = arith.addi %0, %arg1 : i32
    %c0_i32_0 = arith.constant 0 : i32
    %c0_i32_1 = arith.constant 0 : i32
    return %1, %c0_i32_0 : i32, i32
  }
  func.func @transform_2(%arg0: i32, %arg1: i32) -> (i32, i32) {
    %c0_i32 = arith.constant 0 : i32
    %0 = arith.muli %arg0, %c0_i32 : i32
    %1 = arith.addi %0, %arg1 : i32
    %c0_i32_0 = arith.constant 0 : i32
    %c0_i32_1 = arith.constant 0 : i32
    return %1, %c0_i32_0 : i32, i32
  }
  func.func @transform_3(%arg0: i32, %arg1: i32) -> (i32, i32, i32) {
    %c0_i32 = arith.constant 0 : i32
    %c0_i32_0 = arith.constant 0 : i32
    %c0_i32_1 = arith.constant 0 : i32
    return %arg0, %c0_i32, %c0_i32_0 : i32, i32, i32
  }
}

</mosaic_0001>

<bundles_post_ra>
// kernel: tpu_custom_call.1
= control target key start
LH: loop header
LB: loop body
LE: loop exit
PB: predicated region body
PF: predicated region fallthrough
CT: control target
= control target key end

     0   :  { %8 = vsyncpa [#allocation4], 0  ;;  %s341_s0 = inlined_call_operand.hbm [shape: f32[4,256], index: 0, kind: input, shape index: {}]   ;;  %s342_s1 = inlined_call_operand.hbm [shape: f32[8,256], index: 1, kind: input, shape index: {}]   ;;  %s343_s2 = inlined_call_operand.hbm [shape: f32[8,256], index: 2, kind: input, shape index: {}]   ;;  %s344_s3 = inlined_call_operand.hbm [shape: f32[1,1,1], index: 3, kind: output, shape index: {}]  }
   0x1   :  { %9 = vsyncpa [#allocation7], 0  ;;  %s27_s14 = sshll.u32 %s342_s1, 4  ;;  %s28_s14 = int_to_ptr.hbm [resolvable:$true] %s27_s14 }
   0x2   :  { %10 = vsyncpa [#allocation5], 0  ;;  %s299_s15 = smov [#allocation6]   ;;  %s16_s19 = sshll.u32 %s341_s0, 4  ;;  %s17_s19 = int_to_ptr.hbm [resolvable:$true] %s16_s19 }
   0x3   :  { %s29_s16 = sshll.u32 %s299_s15, 4  ;;  %s300_s20 = smov [#allocation3]   ;;  %s30_s16 = int_to_ptr.vmem [resolvable:$true] %s29_s16 }
   0x4   :  { %32 = dma.hbm_to_vmem [thread:$0]  %s28_s14, 256, %s30_s16, [#allocation7]  }
   0x5   :  { %s18_s21 = sshll.u32 %s300_s20, 4  ;;  %s38_s24 = sshll.u32 %s343_s2, 4  ;;  %s19_s21 = int_to_ptr.vmem [resolvable:$true] %s18_s21  ;;  %s39_s24 = int_to_ptr.hbm [resolvable:$true] %s38_s24 }
   0x6   :  { %21 = dma.hbm_to_vmem [thread:$0]  %s17_s19, 128, %s19_s21, [#allocation4]  }
   0x7   :  { %s301_s1 = smov [#allocation8]  }
   0x8   :  { %s40_s25 = sshll.u32 %s301_s1, 4  ;;  %s41_s25 = int_to_ptr.vmem [resolvable:$true] %s40_s25 }
   0x9   :  { %43 = dma.hbm_to_vmem [thread:$0]  %s39_s24, 256, %s41_s25, [#allocation7]  }
   0xa   :  { %293 = dma.done.wait [#allocation4], 128  }
   0xb   :  { %294 = vsyncadd [#allocation4], 4294967168 }
   0xc   :  { %295 = dma.done.wait [#allocation7], 512  }
   0xd   :  { %296 = vsyncadd [#allocation7], 4294966784  ;;  %v62_v0 = vld [vmem:[#allocation8] sm:$0xff]  ;;  %s302_s0 = smov 112   ;;  %s303_s26 = smov 16   ;;  %v63_v1 = vld [vmem:[#allocation8 + $0x8] sm:$0xff]  ;;  %v81_v2 = vlaneseq }
   0xe   :  { %93 = vrot.lane.b32.xlu1 %v62_v0, %s302_s0  ;;  %77 = vrot.lane.b32.xlu0 %v62_v0, %s303_s26  ;;  %s304_s27 = smov 1   ;;  %s305_s2 = smov 127   ;;  %v68_v7 = vld [vmem:[#allocation3 + $0x1] ss:$4 sm:$0x3]  ;;  %v73_v21 = vmul.f32 -4.0, %v62_v0 }
   0xf   :  { %109 = vrot.lane.b32.xlu2 %v62_v0, %s304_s27  ;;  %v82_v6 = vand.u32 127, %v81_v2  ;;  %v66_v8 = vld [vmem:[#allocation3] ss:$4 sm:$0x3]  ;;  %v101_v9 = vperm.slane %v68_v7, 0  ;;  %v102_v10 = vperm.slane %v68_v7, 1 }
  0x10   :  { %v87_v12 = vperm.slane %v66_v8, 0  ;;  %v88_v13 = vperm.slane %v66_v8, 1  ;;  %v70_v19 = vld [vmem:[#allocation3 + $0x2] ss:$4 sm:$0x3]  ;;  %v74_v22 = vmul.f32 -4.0, %v63_v1 }
  0x11   :  { %vm97_vm0 = vcmp.lt.s32.totalorder %v82_v6, 112  ;;  %vm83_vm1 = vcmp.lt.s32.totalorder %v82_v6, 16  ;;  %vm113_vm2 = vcmp.lt.s32.totalorder %v82_v6, 1  ;;  %v72_v20 = vld [vmem:[#allocation3 + $0x3] ss:$4 sm:$0x3] }
  0x12   :  { %v117_v28 = vperm.slane %v70_v19, 0  ;;  %v64_v29 = vld [vmem:[#allocation6] sm:$0xff]  ;;  %v65_v30 = vld [vmem:[#allocation6 + $0x8] sm:$0xff]  ;;  %v118_v31 = vperm.slane %v70_v19, 1  ;;  %vm127_vm3 = vcmp.lt.s32.totalorder %v82_v6, 127  ;;  %v131_v32 = vperm.slane %v72_v20, 0 }
  0x13   :  { %v132_v33 = vperm.slane %v72_v20, 1  ;;  %v75_v40 = vsub.f32 %v73_v21, %v64_v29  ;;  %v76_v41 = vsub.f32 %v74_v22, %v65_v30  ;;  %s306_s28 = smov [#allocation9]   ;;  %s176_s5 = sshll.u32 %s344_s3, 4  ;;  %vm167_vm4 = vcmask 0   ;;  %s177_s5 = int_to_ptr.hbm [resolvable:$true] %s176_s5 }
  0x14   :  { %s174_s29 = sshll.u32 %s306_s28, 4  ;;  %s175_s29 = int_to_ptr.vmem [resolvable:$true] %s174_s29 }
  0x16   :  { %95 = vrot.lane.b32.xlu1 %v63_v1, %s302_s0  ;;  %79 = vrot.lane.b32.xlu0 %v63_v1, %s303_s26 }
  0x17   :  { %111 = vrot.lane.b32.xlu2 %v63_v1, %s304_s27 }
  0x1e   :  { %125 = vrot.lane.b32.xlu1 %v63_v1, %s305_s2  ;;  %123 = vrot.lane.b32.xlu0 %v62_v0, %s305_s2 }
  0x69   :  { %v110_v5 = vpop.permute.xlu2 %109 }
  0x71   :  { %v112_v23 = vpop.permute.xlu2 %111 }
  0x72   :  { %v114_v34 = vsel %vm113_vm2, %v110_v5, %v112_v23  ;;  %v115_v35 = vsel %vm113_vm2, %v112_v23, %v110_v5 }
  0x73   :  { %v121_v44 = vmul.f32 %v117_v28, %v115_v35  ;;  %v122_v45 = vmul.f32 %v118_v31, %v114_v34 }
  0x80   :  { %v94_v3 = vpop.permute.xlu1 %93  ;;  %v78_v4 = vpop.permute.xlu0 %77 }
  0x88   :  { %v96_v11 = vpop.permute.xlu1 %95  ;;  %v80_v14 = vpop.permute.xlu0 %79 }
  0x89   :  { %v98_v15 = vsel %vm97_vm0, %v94_v3, %v96_v11  ;;  %v99_v16 = vsel %vm97_vm0, %v96_v11, %v94_v3  ;;  %v84_v17 = vsel %vm83_vm1, %v78_v4, %v80_v14  ;;  %v85_v18 = vsel %vm83_vm1, %v80_v14, %v78_v4 }
  0x8a   :  { %v105_v24 = vmul.f32 %v101_v9, %v98_v15  ;;  %v106_v25 = vmul.f32 %v102_v10, %v99_v16  ;;  %v91_v26 = vmul.f32 %v87_v12, %v85_v18  ;;  %v92_v27 = vmul.f32 %v88_v13, %v84_v17 }
  0x8c   :  { %v107_v36 = vadd.f32 %v105_v24, %v91_v26  ;;  %v108_v37 = vadd.f32 %v106_v25, %v92_v27 }
  0x8e   :  { %v139_v50 = vadd.f32 %v107_v36, %v75_v40  ;;  %v140_v51 = vadd.f32 %v108_v37, %v76_v41 }
  0x90   :  { %v126_v38 = vpop.permute.xlu1 %125  ;;  %v124_v39 = vpop.permute.xlu0 %123 }
  0x91   :  { %v128_v42 = vsel %vm127_vm3, %v124_v39, %v126_v38  ;;  %v129_v43 = vsel %vm127_vm3, %v126_v38, %v124_v39 }
  0x92   :  { %v135_v46 = vmul.f32 %v131_v32, %v128_v42  ;;  %v136_v47 = vmul.f32 %v132_v33, %v129_v43 }
  0x94   :  { %v137_v48 = vadd.f32 %v135_v46, %v121_v44  ;;  %v138_v49 = vadd.f32 %v136_v47, %v122_v45 }
  0x96   :  { %v141_v52 = vadd.f32 %v139_v50, %v137_v48  ;;  %v142_v53 = vadd.f32 %v140_v51, %v138_v49 }
  0x98   :  { %v145_v54 = vmul.f32 %v141_v52, %v141_v52  ;;  %v146_v55 = vmul.f32 %v142_v53, %v142_v53 }
  0x9a   :  { %v156_v56 = vadd.f32 %v146_v55, %v145_v54 }
  0x9c   :  { %157 = vadd.xlane.f32.xlu2 %v156_v56 }
 0x10f   :  { %v158_v57 = vpop.xlane.xlu2 %157 }
 0x110   :  { %v159_v58 = vrot.slane %v158_v57, 4 }
 0x112   :  { %v160_v59 = vadd.f32 %v159_v58, %v158_v57 }
 0x114   :  { %v161_v60 = vrot.slane %v160_v59, 2 }
 0x116   :  { %v162_v61 = vadd.f32 %v161_v60, %v160_v59 }
 0x118   :  { %v163_v62 = vrot.slane %v162_v61, 1 }
 0x11a   :  { %v164_v63 = vadd.f32 %v163_v62, %v162_v61 }
 0x11c   :  { %187 = vpush %v164_v63 }
 0x14d   :  { %s188_s6 = spop %187 }
 0x14e   :  { %v166_v0 = vstv %s188_s6 }
 0x14f   :  { %168 = vst.msk [vmem:[#allocation9] sm:$0x1] %vm167_vm4, %v166_v0 }
 0x150   :  { %179 = dma.vmem_to_hbm [thread:$0]  %s175_s29, 16, %s177_s5, [#allocation5]  }
 0x151   :  { %297 = dma.done.wait [#allocation5], 16  }
 0x152   :  { %298 = vsyncadd [#allocation5], 4294967280 }
 0x153   :  { %184 = vsyncpa [#allocation4], 1 }
 0x154   :  { %185 = vsyncpa [#allocation7], 1 }
 0x155   :  { %186 = vsyncpa [#allocation5], 1 }

</bundles_post_ra>
